<compile_context>
chip_gen: v6e
topology: v6e:2x2x1
jax: 0.10.0
libtpu: 0.0.40
codegen_flags: <defaults>
</compile_context>

<pallas_src>
import functools

import jax
import jax.numpy as jnp
import numpy as np
from jax.experimental import pallas as pl
from jax.experimental.pallas import tpu as pltpu


def _compiler_params():
    # CompilerParams on recent JAX, TPUCompilerParams on older releases.
    cls = getattr(pltpu, "CompilerParams", None)
    if cls is None:
        cls = pltpu.TPUCompilerParams
    return cls(dimension_semantics=("parallel",))


def _conv_relu_argmax_kernel(w_ref, x_ref, v1_ref, v2_ref, *,
                             kh, kw, c_in, out_c, ho, w_in, b_blk):
    """One grid step == `b_blk` images.

    w_ref : (out_c, kh*kw*c_in)        bf16  (VMEM-resident, constant index_map)
    x_ref : (b_blk, c_in, H*W + kw-1)  bf16  (flattened spatial, zero tail pad)
    v1_ref: (b_blk, out_c, ho*W)       f32   (full-width rows; wrapper slices)
    v2_ref: (1, 1, b_blk*ho*W)         i32   (channel argmax, flattened)
    """
    how = ho * w_in                       # full-width flattened spatial / image

    # --- im2col: one (K_TOT, b_blk*how) patch built from pure lane slices ----
    cols = []
    for b in range(b_blk):
        taps = []
        for dy in range(kh):
            for dx in range(kw):
                off = dy * w_in + dx
                taps.append(x_ref[b, :, off:off + how])       # (c_in, how)
        cols.append(jnp.concatenate(taps, axis=0))            # (k_tot, how)
    patch = cols[0] if b_blk == 1 else jnp.concatenate(cols, axis=1)

    # --- the whole conv as ONE MXU matmul, contraction depth kh*kw*c_in ------
    acc = jnp.dot(w_ref[...], patch,
                  preferred_element_type=jnp.float32)          # (out_c, B*how)
    v1 = jnp.maximum(acc, 0.0)                                 # ReLU, f32

    # --- channel argmax, first occurrence wins (matches torch.argmax) --------
    # NOTE: a NaN column would yield index out_c here (torch returns the NaN
    # position); inputs in this module are finite.
    ch = jax.lax.broadcasted_iota(jnp.int32, v1.shape, 0)
    row_max = jnp.max(v1, axis=0, keepdims=True)
    idx = jnp.min(jnp.where(v1 == row_max, ch, out_c),
                  axis=0, keepdims=True)                       # (1, B*how) i32

    # --- lane-dense stores ----------------------------------------------------
    for b in range(b_blk):
        v1_ref[b] = v1[:, b * how:(b + 1) * how].astype(v1_ref.dtype)
    v2_ref[0, 0, :] = idx[0, :]


def _pick_images_per_step(n):
    # Amortize the ~0.35us per-grid-step overhead on tiny images.
    for b in (16, 8, 4, 2, 1):
        if n % b == 0:
            return b
    return 1


@jax.jit
def conv_rel_forward(x, weight):
    """x: (N, 3, H, W) f32 NCHW; weight: (31, 3, 3, 5) f32 OIHW.

    Returns (v1, v2, v4):
      v1: (N, 31, H-2, W-4) f32   conv + ReLU
      v2: (N, H-2, W-4)     i32   channel argmax   (torch: int64)
      v4: (N*(H-2)*(W-4),)  i32   flatten(v2 * v2)
    """
    N, C, H, W = x.shape
    OUT_C, C2, KH, KW = weight.shape
    assert C == C2
    Ho, Wo = H - KH + 1, W - KW + 1
    K_TOT = KH * KW * C
    HOW = Ho * W                   # full-width flattened output spatial / image
    HWP = H * W + (KW - 1)         # flat input + tail pad so every tap slice of
                                   # length Ho*W stays in bounds

    B = _pick_images_per_step(N)
    steps = N // B

    # bf16 MXU inputs (f32 accumulation in-kernel); flattened spatial keeps the
    # lane axis >= 128 wide and makes every tap gather a pure lane slice.
    xb = jnp.pad(x.reshape(N, C, H * W).astype(jnp.bfloat16),
                 ((0, 0), (0, 0), (0, KW - 1)))
    # (O, I, KH, KW) -> (O, KH, KW, I) -> (O, KH*KW*I); column = (dy*KW+dx)*C+cin
    wb = jnp.transpose(weight, (0, 2, 3, 1)).reshape(OUT_C, K_TOT).astype(jnp.bfloat16)

    kernel = functools.partial(
        _conv_relu_argmax_kernel,
        kh=KH, kw=KW, c_in=C, out_c=OUT_C, ho=Ho, w_in=W, b_blk=B)

    v1_flat, v2_flat = pl.pallas_call(
        kernel,
        grid=(steps,),
        in_specs=[
            # weight: full array, constant index -> DMA'd once, VMEM-resident
            pl.BlockSpec((OUT_C, K_TOT), lambda n: (0, 0)),
            # B images per grid step
            pl.BlockSpec((B, C, HWP), lambda n: (n, 0, 0)),
        ],
        out_specs=[
            pl.BlockSpec((B, OUT_C, HOW), lambda n: (n, 0, 0)),
            pl.BlockSpec((1, 1, B * HOW), lambda n: (n, 0, 0)),
        ],
        out_shape=(
            jax.ShapeDtypeStruct((N, OUT_C, HOW), jnp.float32),
            jax.ShapeDtypeStruct((steps, 1, B * HOW), jnp.int32),
        ),
        compiler_params=_compiler_params(),
    )(wb, xb)

    # Cheap reshapes + a slice that drops the KW-1 invalid full-width columns.
    v1 = v1_flat.reshape(N, OUT_C, Ho, W)[:, :, :, :Wo]
    v2 = v2_flat.reshape(N, Ho, W)[:, :, :Wo]
    v4 = (v2 * v2).reshape(-1)          # v3 == v2, so mul(v2, v3) == v2*v2
    return v1, v2, v4


if __name__ == "__main__":
    key = jax.random.PRNGKey(0)
    kx, kw_key = jax.random.split(key)

    N, C, H, W = 2, 3, 16, 16
    OUT_C, KH, KW = 31, 3, 5

    x = jax.random.normal(kx, (N, C, H, W), jnp.float32)
    # Conv2d default init: U(-b, b), b = 1/sqrt(fan_in)
    bound = 1.0 / np.sqrt(C * KH * KW)
    weight = jax.random.uniform(kw_key, (OUT_C, C, KH, KW), jnp.float32,
                                minval=-bound, maxval=bound)

    v1, v2, v4 = jax.block_until_ready(conv_rel_forward(x, weight))

    # Reference computed with XLA on the same bf16-rounded inputs.
    xb = x.astype(jnp.bfloat16).astype(jnp.float32)
    wb = weight.astype(jnp.bfloat16).astype(jnp.float32)
    ref = jax.lax.conv_general_dilated(
        xb, wb, (1, 1), "VALID",
        dimension_numbers=("NCHW", "OIHW", "NCHW"))
    ref_v1 = jnp.maximum(ref, 0.0)
    ref_v2 = jnp.argmax(ref_v1, axis=1).astype(jnp.int32)
    ref_v4 = (ref_v2 * ref_v2).reshape(-1)

    Ho, Wo = H - KH + 1, W - KW + 1
    assert v1.shape == (N, OUT_C, Ho, Wo)
    assert v2.shape == (N, Ho, Wo)
    assert v4.shape == (N * Ho * Wo,)

    np.testing.assert_allclose(np.asarray(v1), np.asarray(ref_v1),
                               rtol=2e-2, atol=2e-2)
    match = float(np.mean(np.asarray(v2) == np.asarray(ref_v2)))
    assert match > 0.98, f"argmax mismatch fraction too high: {1.0 - match}"
    # v4 wiring (exact) and value agreement with the reference.
    np.testing.assert_array_equal(np.asarray(v4),
                                  (np.asarray(v2).astype(np.int64) ** 2)
                                  .astype(np.int32).reshape(-1))
    v4_match = float(np.mean(np.asarray(v4) == np.asarray(ref_v4)))
    assert v4_match > 0.98, f"v4 mismatch fraction too high: {1.0 - v4_match}"

    print("KERNEL_OK")
</pallas_src>

<mosaic_0001>
module attributes {stable_mosaic.version = 11 : i64} {
  func.func @_conv_relu_argmax_kernel(%arg0: i32, %arg1: memref<31x45xbf16, #tpu.memory_space<vmem>>, %arg2: memref<2x3x260xbf16, #tpu.memory_space<vmem>>, %arg3: memref<2x31x224xf32, #tpu.memory_space<vmem>>, %arg4: memref<1x1x448xi32, #tpu.memory_space<vmem>>) attributes {dimension_semantics = [#tpu.dimension_semantics<parallel>], iteration_bounds = array<i64: 1>, scalar_prefetch = 0 : i64, scratch_operands = 0 : i64, tpu.core_type = #tpu.core_type<tc>, window_params = [{pipeline_mode = #tpu.pipeline_mode<synchronous>, transform_indices = @transform_0, window_bounds = array<i64: 31, 45>}, {transform_indices = @transform_1, window_bounds = array<i64: 2, 3, 260>}, {transform_indices = @transform_2, window_bounds = array<i64: 2, 31, 224>}, {transform_indices = @transform_3, window_bounds = array<i64: 1, 1, 448>}]} {
    %c0 = arith.constant 0 : index
    %c0_0 = arith.constant 0 : index
    %c0_1 = arith.constant 0 : index
    %0 = vector.load %arg2[%c0, %c0_0, %c0_1] : memref<2x3x260xbf16, #tpu.memory_space<vmem>>, vector<1x3x224xbf16>
    %1 = vector.shape_cast %0 : vector<1x3x224xbf16> to vector<3x224xbf16>
    %c0_2 = arith.constant 0 : index
    %c0_3 = arith.constant 0 : index
    %c1 = arith.constant 1 : index
    %2 = vector.load %arg2[%c0_2, %c0_3, %c1] : memref<2x3x260xbf16, #tpu.memory_space<vmem>>, vector<1x3x224xbf16>
    %3 = vector.shape_cast %2 : vector<1x3x224xbf16> to vector<3x224xbf16>
    %c0_4 = arith.constant 0 : index
    %c0_5 = arith.constant 0 : index
    %c2 = arith.constant 2 : index
    %4 = vector.load %arg2[%c0_4, %c0_5, %c2] : memref<2x3x260xbf16, #tpu.memory_space<vmem>>, vector<1x3x224xbf16>
    %5 = vector.shape_cast %4 : vector<1x3x224xbf16> to vector<3x224xbf16>
    %c0_6 = arith.constant 0 : index
    %c0_7 = arith.constant 0 : index
    %c3 = arith.constant 3 : index
    %6 = vector.load %arg2[%c0_6, %c0_7, %c3] : memref<2x3x260xbf16, #tpu.memory_space<vmem>>, vector<1x3x224xbf16>
    %7 = vector.shape_cast %6 : vector<1x3x224xbf16> to vector<3x224xbf16>
    %c0_8 = arith.constant 0 : index
    %c0_9 = arith.constant 0 : index
    %c4 = arith.constant 4 : index
    %8 = vector.load %arg2[%c0_8, %c0_9, %c4] : memref<2x3x260xbf16, #tpu.memory_space<vmem>>, vector<1x3x224xbf16>
    %9 = vector.shape_cast %8 : vector<1x3x224xbf16> to vector<3x224xbf16>
    %c0_10 = arith.constant 0 : index
    %c0_11 = arith.constant 0 : index
    %c16 = arith.constant 16 : index
    %10 = vector.load %arg2[%c0_10, %c0_11, %c16] : memref<2x3x260xbf16, #tpu.memory_space<vmem>>, vector<1x3x224xbf16>
    %11 = vector.shape_cast %10 : vector<1x3x224xbf16> to vector<3x224xbf16>
    %c0_12 = arith.constant 0 : index
    %c0_13 = arith.constant 0 : index
    %c17 = arith.constant 17 : index
    %12 = vector.load %arg2[%c0_12, %c0_13, %c17] : memref<2x3x260xbf16, #tpu.memory_space<vmem>>, vector<1x3x224xbf16>
    %13 = vector.shape_cast %12 : vector<1x3x224xbf16> to vector<3x224xbf16>
    %c0_14 = arith.constant 0 : index
    %c0_15 = arith.constant 0 : index
    %c18 = arith.constant 18 : index
    %14 = vector.load %arg2[%c0_14, %c0_15, %c18] : memref<2x3x260xbf16, #tpu.memory_space<vmem>>, vector<1x3x224xbf16>
    %15 = vector.shape_cast %14 : vector<1x3x224xbf16> to vector<3x224xbf16>
    %c0_16 = arith.constant 0 : index
    %c0_17 = arith.constant 0 : index
    %c19 = arith.constant 19 : index
    %16 = vector.load %arg2[%c0_16, %c0_17, %c19] : memref<2x3x260xbf16, #tpu.memory_space<vmem>>, vector<1x3x224xbf16>
    %17 = vector.shape_cast %16 : vector<1x3x224xbf16> to vector<3x224xbf16>
    %c0_18 = arith.constant 0 : index
    %c0_19 = arith.constant 0 : index
    %c20 = arith.constant 20 : index
    %18 = vector.load %arg2[%c0_18, %c0_19, %c20] : memref<2x3x260xbf16, #tpu.memory_space<vmem>>, vector<1x3x224xbf16>
    %19 = vector.shape_cast %18 : vector<1x3x224xbf16> to vector<3x224xbf16>
    %c0_20 = arith.constant 0 : index
    %c0_21 = arith.constant 0 : index
    %c32 = arith.constant 32 : index
    %20 = vector.load %arg2[%c0_20, %c0_21, %c32] : memref<2x3x260xbf16, #tpu.memory_space<vmem>>, vector<1x3x224xbf16>
    %21 = vector.shape_cast %20 : vector<1x3x224xbf16> to vector<3x224xbf16>
    %c0_22 = arith.constant 0 : index
    %c0_23 = arith.constant 0 : index
    %c33 = arith.constant 33 : index
    %22 = vector.load %arg2[%c0_22, %c0_23, %c33] : memref<2x3x260xbf16, #tpu.memory_space<vmem>>, vector<1x3x224xbf16>
    %23 = vector.shape_cast %22 : vector<1x3x224xbf16> to vector<3x224xbf16>
    %c0_24 = arith.constant 0 : index
    %c0_25 = arith.constant 0 : index
    %c34 = arith.constant 34 : index
    %24 = vector.load %arg2[%c0_24, %c0_25, %c34] : memref<2x3x260xbf16, #tpu.memory_space<vmem>>, vector<1x3x224xbf16>
    %25 = vector.shape_cast %24 : vector<1x3x224xbf16> to vector<3x224xbf16>
    %c0_26 = arith.constant 0 : index
    %c0_27 = arith.constant 0 : index
    %c35 = arith.constant 35 : index
    %26 = vector.load %arg2[%c0_26, %c0_27, %c35] : memref<2x3x260xbf16, #tpu.memory_space<vmem>>, vector<1x3x224xbf16>
    %27 = vector.shape_cast %26 : vector<1x3x224xbf16> to vector<3x224xbf16>
    %c0_28 = arith.constant 0 : index
    %c0_29 = arith.constant 0 : index
    %c36 = arith.constant 36 : index
    %28 = vector.load %arg2[%c0_28, %c0_29, %c36] : memref<2x3x260xbf16, #tpu.memory_space<vmem>>, vector<1x3x224xbf16>
    %29 = vector.shape_cast %28 : vector<1x3x224xbf16> to vector<3x224xbf16>
    %30 = tpu.concatenate %1, %3, %5, %7, %9, %11, %13, %15, %17, %19, %21, %23, %25, %27, %29 in 0 : vector<3x224xbf16>, vector<3x224xbf16>, vector<3x224xbf16>, vector<3x224xbf16>, vector<3x224xbf16>, vector<3x224xbf16>, vector<3x224xbf16>, vector<3x224xbf16>, vector<3x224xbf16>, vector<3x224xbf16>, vector<3x224xbf16>, vector<3x224xbf16>, vector<3x224xbf16>, vector<3x224xbf16>, vector<3x224xbf16> -> vector<45x224xbf16>
    %c1_30 = arith.constant 1 : index
    %c0_31 = arith.constant 0 : index
    %c0_32 = arith.constant 0 : index
    %31 = vector.load %arg2[%c1_30, %c0_31, %c0_32] : memref<2x3x260xbf16, #tpu.memory_space<vmem>>, vector<1x3x224xbf16>
    %32 = vector.shape_cast %31 : vector<1x3x224xbf16> to vector<3x224xbf16>
    %c1_33 = arith.constant 1 : index
    %c0_34 = arith.constant 0 : index
    %c1_35 = arith.constant 1 : index
    %33 = vector.load %arg2[%c1_33, %c0_34, %c1_35] : memref<2x3x260xbf16, #tpu.memory_space<vmem>>, vector<1x3x224xbf16>
    %34 = vector.shape_cast %33 : vector<1x3x224xbf16> to vector<3x224xbf16>
    %c1_36 = arith.constant 1 : index
    %c0_37 = arith.constant 0 : index
    %c2_38 = arith.constant 2 : index
    %35 = vector.load %arg2[%c1_36, %c0_37, %c2_38] : memref<2x3x260xbf16, #tpu.memory_space<vmem>>, vector<1x3x224xbf16>
    %36 = vector.shape_cast %35 : vector<1x3x224xbf16> to vector<3x224xbf16>
    %c1_39 = arith.constant 1 : index
    %c0_40 = arith.constant 0 : index
    %c3_41 = arith.constant 3 : index
    %37 = vector.load %arg2[%c1_39, %c0_40, %c3_41] : memref<2x3x260xbf16, #tpu.memory_space<vmem>>, vector<1x3x224xbf16>
    %38 = vector.shape_cast %37 : vector<1x3x224xbf16> to vector<3x224xbf16>
    %c1_42 = arith.constant 1 : index
    %c0_43 = arith.constant 0 : index
    %c4_44 = arith.constant 4 : index
    %39 = vector.load %arg2[%c1_42, %c0_43, %c4_44] : memref<2x3x260xbf16, #tpu.memory_space<vmem>>, vector<1x3x224xbf16>
    %40 = vector.shape_cast %39 : vector<1x3x224xbf16> to vector<3x224xbf16>
    %c1_45 = arith.constant 1 : index
    %c0_46 = arith.constant 0 : index
    %c16_47 = arith.constant 16 : index
    %41 = vector.load %arg2[%c1_45, %c0_46, %c16_47] : memref<2x3x260xbf16, #tpu.memory_space<vmem>>, vector<1x3x224xbf16>
    %42 = vector.shape_cast %41 : vector<1x3x224xbf16> to vector<3x224xbf16>
    %c1_48 = arith.constant 1 : index
    %c0_49 = arith.constant 0 : index
    %c17_50 = arith.constant 17 : index
    %43 = vector.load %arg2[%c1_48, %c0_49, %c17_50] : memref<2x3x260xbf16, #tpu.memory_space<vmem>>, vector<1x3x224xbf16>
    %44 = vector.shape_cast %43 : vector<1x3x224xbf16> to vector<3x224xbf16>
    %c1_51 = arith.constant 1 : index
    %c0_52 = arith.constant 0 : index
    %c18_53 = arith.constant 18 : index
    %45 = vector.load %arg2[%c1_51, %c0_52, %c18_53] : memref<2x3x260xbf16, #tpu.memory_space<vmem>>, vector<1x3x224xbf16>
    %46 = vector.shape_cast %45 : vector<1x3x224xbf16> to vector<3x224xbf16>
    %c1_54 = arith.constant 1 : index
    %c0_55 = arith.constant 0 : index
    %c19_56 = arith.constant 19 : index
    %47 = vector.load %arg2[%c1_54, %c0_55, %c19_56] : memref<2x3x260xbf16, #tpu.memory_space<vmem>>, vector<1x3x224xbf16>
    %48 = vector.shape_cast %47 : vector<1x3x224xbf16> to vector<3x224xbf16>
    %c1_57 = arith.constant 1 : index
    %c0_58 = arith.constant 0 : index
    %c20_59 = arith.constant 20 : index
    %49 = vector.load %arg2[%c1_57, %c0_58, %c20_59] : memref<2x3x260xbf16, #tpu.memory_space<vmem>>, vector<1x3x224xbf16>
    %50 = vector.shape_cast %49 : vector<1x3x224xbf16> to vector<3x224xbf16>
    %c1_60 = arith.constant 1 : index
    %c0_61 = arith.constant 0 : index
    %c32_62 = arith.constant 32 : index
    %51 = vector.load %arg2[%c1_60, %c0_61, %c32_62] : memref<2x3x260xbf16, #tpu.memory_space<vmem>>, vector<1x3x224xbf16>
    %52 = vector.shape_cast %51 : vector<1x3x224xbf16> to vector<3x224xbf16>
    %c1_63 = arith.constant 1 : index
    %c0_64 = arith.constant 0 : index
    %c33_65 = arith.constant 33 : index
    %53 = vector.load %arg2[%c1_63, %c0_64, %c33_65] : memref<2x3x260xbf16, #tpu.memory_space<vmem>>, vector<1x3x224xbf16>
    %54 = vector.shape_cast %53 : vector<1x3x224xbf16> to vector<3x224xbf16>
    %c1_66 = arith.constant 1 : index
    %c0_67 = arith.constant 0 : index
    %c34_68 = arith.constant 34 : index
    %55 = vector.load %arg2[%c1_66, %c0_67, %c34_68] : memref<2x3x260xbf16, #tpu.memory_space<vmem>>, vector<1x3x224xbf16>
    %56 = vector.shape_cast %55 : vector<1x3x224xbf16> to vector<3x224xbf16>
    %c1_69 = arith.constant 1 : index
    %c0_70 = arith.constant 0 : index
    %c35_71 = arith.constant 35 : index
    %57 = vector.load %arg2[%c1_69, %c0_70, %c35_71] : memref<2x3x260xbf16, #tpu.memory_space<vmem>>, vector<1x3x224xbf16>
    %58 = vector.shape_cast %57 : vector<1x3x224xbf16> to vector<3x224xbf16>
    %c1_72 = arith.constant 1 : index
    %c0_73 = arith.constant 0 : index
    %c36_74 = arith.constant 36 : index
    %59 = vector.load %arg2[%c1_72, %c0_73, %c36_74] : memref<2x3x260xbf16, #tpu.memory_space<vmem>>, vector<1x3x224xbf16>
    %60 = vector.shape_cast %59 : vector<1x3x224xbf16> to vector<3x224xbf16>
    %61 = tpu.concatenate %32, %34, %36, %38, %40, %42, %44, %46, %48, %50, %52, %54, %56, %58, %60 in 0 : vector<3x224xbf16>, vector<3x224xbf16>, vector<3x224xbf16>, vector<3x224xbf16>, vector<3x224xbf16>, vector<3x224xbf16>, vector<3x224xbf16>, vector<3x224xbf16>, vector<3x224xbf16>, vector<3x224xbf16>, vector<3x224xbf16>, vector<3x224xbf16>, vector<3x224xbf16>, vector<3x224xbf16>, vector<3x224xbf16> -> vector<45x224xbf16>
    %62 = tpu.concatenate %30, %61 in 1 : vector<45x224xbf16>, vector<45x224xbf16> -> vector<45x448xbf16>
    %c0_75 = arith.constant 0 : index
    %c0_76 = arith.constant 0 : index
    %63 = vector.load %arg1[%c0_75, %c0_76] : memref<31x45xbf16, #tpu.memory_space<vmem>>, vector<31x45xbf16>
    %cst = arith.constant dense<0.000000e+00> : vector<31x448xf32>
    %64 = tpu.matmul %63, %62, %cst {dimension_numbers = #tpu.dot_dimension_numbers<[1], [0], [0], [1], [0, 0, 1, 1], [], []>} : vector<31x45xbf16>, vector<45x448xbf16>, vector<31x448xf32> -> vector<31x448xf32>
    %cst_77 = arith.constant 0.000000e+00 : f32
    %65 = vector.broadcast %cst_77 : f32 to vector<31x448xf32>
    %66 = arith.maximumf %64, %65 : vector<31x448xf32>
    %67 = tpu.iota {dimensions = array<i32: 0>} : vector<31x448xi32>
    %cst_78 = arith.constant dense<0xFF800000> : vector<448xf32>
    %68 = vector.multi_reduction <maximumf>, %66, %cst_78 [0] : vector<31x448xf32> to vector<448xf32>
    %69 = vector.shape_cast %68 : vector<448xf32> to vector<1x448xf32>
    %70 = vector.broadcast %69 : vector<1x448xf32> to vector<31x448xf32>
    %71 = arith.cmpf oeq, %66, %70 : vector<31x448xf32>
    %c31_i32 = arith.constant 31 : i32
    %72 = vector.broadcast %c31_i32 : i32 to vector<31x448xi32>
    %73 = arith.select %71, %67, %72 : vector<31x448xi1>, vector<31x448xi32>
    %cst_79 = arith.constant dense<2147483647> : vector<448xi32>
    %74 = vector.multi_reduction <minsi>, %73, %cst_79 [0] : vector<31x448xi32> to vector<448xi32>
    %75 = vector.shape_cast %74 : vector<448xi32> to vector<1x448xi32>
    %76 = vector.extract_strided_slice %66 {offsets = [0, 0], sizes = [31, 224], strides = [1, 1]} : vector<31x448xf32> to vector<31x224xf32>
    %c0_80 = arith.constant 0 : index
    %c0_81 = arith.constant 0 : index
    %c0_82 = arith.constant 0 : index
    %77 = vector.load %arg3[%c0_80, %c0_81, %c0_82] : memref<2x31x224xf32, #tpu.memory_space<vmem>>, vector<1x31x224xf32>
    %78 = vector.shape_cast %77 : vector<1x31x224xf32> to vector<31x224xf32>
    %79 = vector.shape_cast %76 : vector<31x224xf32> to vector<1x31x224xf32>
    tpu.vector_store %arg3[%c0_80, %c0_81, %c0_82], %79 {strides = array<i32>} : memref<2x31x224xf32, #tpu.memory_space<vmem>>, vector<1x31x224xf32>,
    %80 = vector.extract_strided_slice %66 {offsets = [0, 224], sizes = [31, 224], strides = [1, 1]} : vector<31x448xf32> to vector<31x224xf32>
    %c1_83 = arith.constant 1 : index
    %c0_84 = arith.constant 0 : index
    %c0_85 = arith.constant 0 : index
    %81 = vector.load %arg3[%c1_83, %c0_84, %c0_85] : memref<2x31x224xf32, #tpu.memory_space<vmem>>, vector<1x31x224xf32>
    %82 = vector.shape_cast %81 : vector<1x31x224xf32> to vector<31x224xf32>
    %83 = vector.shape_cast %80 : vector<31x224xf32> to vector<1x31x224xf32>
    tpu.vector_store %arg3[%c1_83, %c0_84, %c0_85], %83 {strides = array<i32>} : memref<2x31x224xf32, #tpu.memory_space<vmem>>, vector<1x31x224xf32>,
    %84 = vector.shape_cast %75 : vector<1x448xi32> to vector<448xi32>
    %c0_86 = arith.constant 0 : index
    %c0_87 = arith.constant 0 : index
    %c0_88 = arith.constant 0 : index
    %85 = vector.load %arg4[%c0_86, %c0_87, %c0_88] : memref<1x1x448xi32, #tpu.memory_space<vmem>>, vector<1x1x448xi32>
    %86 = vector.shape_cast %85 : vector<1x1x448xi32> to vector<448xi32>
    %87 = vector.shape_cast %84 : vector<448xi32> to vector<1x1x448xi32>
    tpu.vector_store %arg4[%c0_86, %c0_87, %c0_88], %87 {strides = array<i32>} : memref<1x1x448xi32, #tpu.memory_space<vmem>>, vector<1x1x448xi32>,
    return
  }
  func.func @transform_0(%arg0: i32) -> (i32, i32) {
    %c0_i32 = arith.constant 0 : i32
    %c0_i32_0 = arith.constant 0 : i32
    %c0_i32_1 = arith.constant 0 : i32
    return %c0_i32, %c0_i32_0 : i32, i32
  }
  func.func @transform_1(%arg0: i32) -> (i32, i32, i32) {
    %c0_i32 = arith.constant 0 : i32
    %c0_i32_0 = arith.constant 0 : i32
    %c0_i32_1 = arith.constant 0 : i32
    return %arg0, %c0_i32, %c0_i32_0 : i32, i32, i32
  }
  func.func @transform_2(%arg0: i32) -> (i32, i32, i32) {
    %c0_i32 = arith.constant 0 : i32
    %c0_i32_0 = arith.constant 0 : i32
    %c0_i32_1 = arith.constant 0 : i32
    return %arg0, %c0_i32, %c0_i32_0 : i32, i32, i32
  }
  func.func @transform_3(%arg0: i32) -> (i32, i32, i32) {
    %c0_i32 = arith.constant 0 : i32
    %c0_i32_0 = arith.constant 0 : i32
    %c0_i32_1 = arith.constant 0 : i32
    return %arg0, %c0_i32, %c0_i32_0 : i32, i32, i32
  }
}

</mosaic_0001>

<bundles_post_ra>
// kernel: conv_rel_forward.1
= control target key start
LH: loop header
LB: loop body
LE: loop exit
PB: predicated region body
PF: predicated region fallthrough
CT: control target
= control target key end

     0   :  { %v20_v0 = vlaneseq  ;;  %v1148_v1 = vmov 1983009808   ;;  %s1149_s18 = smov 94   ;;  %s1150_s19 = smov 96   ;;  %vm1825_vm0 = vcmask 777216   ;;  %vm1831_vm1 = vcmask 1040384   ;;  %s1817_s1 = inlined_call_operand.vmem [shape: bf16[2,3,260], index: 1, kind: input, shape index: {}]   ;;  %s1818_s0 = inlined_call_operand.vmem [shape: bf16[31,45], index: 0, kind: input, shape index: {}]   ;;  %s1819_s2 = inlined_call_operand.vmem [shape: f32[2,31,224], index: 2, kind: output, shape index: {0}]   ;;  %s1820_s3 = inlined_call_operand.vmem [shape: s32[1,1,448], index: 3, kind: output, shape index: {1}]  }
   0x1   :  { %v18_v2 = vunpack.c.l.s4 %v1148_v1  ;;  %v1096_v3 = vld [vmem:[%s1817_s1 + $0x6] sm:$0x3f]  ;;  %v1196_v7 = vld [vmem:[%s1817_s1] sm:$0xf]  ;;  %s1151_s20 = smov 95   ;;  %s1152_s21 = smov 93  }
   0x2   :  { %v1191_v4 = vshrl.u32 %v20_v0, 7  ;;  %v535_v6 = vcombine.low %v1096_v3, %v1096_v3  ;;  %v1201_v8 = vld [vmem:[%s1817_s1 + $0x6] sm:$0xf]  ;;  %v488_v9 = vcombine.high %v1096_v3, %v1096_v3  ;;  %s1153_s22 = smov 92   ;;  %s1154_s23 = smov 112   ;;  %v73_v60 = vcombine.low %v1196_v7, %v1196_v7 }
   0x3   :  { %v19_v5 = vunpack.c.0.s8 %v18_v2  ;;  %s1155_s24 = smov 111   ;;  %s1156_s25 = smov 110   ;;  %vm327_vm2 = vsmask.f32 256  ;;  %vm1824_vm3 = vcmask 785408   ;;  %vm1822_vm5 = vcmask 760832  }
   0x4   :  { %s1157_s26 = smov 109   ;;  %s1158_s29 = smov 108   ;;  %vm1395_vm4 = vmand %vm1831_vm1, %vm327_vm2  ;;  %vm1827_vm6 = vcmask 1043456   ;;  %vm341_vm7 = vsmask.f32 3328  ;;  %vm1823_vm8 = vcmask 769024  }
   0x5   :  { %v1204_v10 = vsub.s32 %v19_v5, %v1191_v4  ;;  %s1159_s30 = smov 127   ;;  %s1161_s4 = smov 125   ;;  %vm1833_vm9 = vcmask 1041408   ;;  %vm1821_vm10 = vcmask 752640   ;;  %vm1414_vm11 = vmand %vm1827_vm6, %vm341_vm7  ;;  %vm271_vm12 = vcmask 1044480  }
   0x6   :  { %s1162_s5 = smov 124   ;;  %vm1838_vm13 = vcmask 1042432   ;;  %vm300_vm14 = vsmask.f32 2304  ;;  %vm1826_vm15 = vcmask 908288   ;;  %vm276_vm2 = vcmask 1045504  }
   0x7   :  { %v542_v11 = vrot.slane %v535_v6, %v1204_v10  ;;  %v1209_v12 = vrot.slane %v1196_v7, %v1204_v10  ;;  %v1213_v13 = vrot.slane %v1201_v8, %v1204_v10  ;;  %v495_v14 = vrot.slane %v1096_v3, %v1204_v10  ;;  %s1165_s10 = smov 32  }
   0x8   :  { %v502_v15 = vrot.slane %v488_v9, %v1204_v10  ;;  %v1270_v62 = vrot.slane %v73_v60, %v1204_v10  ;;  %vm314_vm7 = vsmask.f32 5376 }
   0x9   :  { %544 = vrot.lane.b32.xlu1 %v542_v11, %s1149_s18  ;;  %v478_v16 = vrot.slane %v1213_v13, 1  ;;  %v505_v17 = vshrl.u32 %v495_v14, 16  ;;  %v508_v18 = vshll.u32 %v495_v14, 16  ;;  %v503_v19 = vcombine.high %v495_v14, %v495_v14 }
   0xa   :  { %v543_v20 = vcombine.high %v542_v11, %v542_v11  ;;  %v1222_v21 = vcombine.high %v1213_v13, %v1213_v13  ;;  %v519_v22 = vshrl.u32 %v502_v15, 16  ;;  %v522_v30 = vshll.u32 %v502_v15, 16  ;;  %v15_v11 = vld [vmem:[%s1817_s1] sm:$0x3f]  ;;  %s1160_s1 = smov 126  }
   0xb   :  { %480 = vrot.lane.b32.xlu0 %v478_v16, %s1150_s19  ;;  %v507_v23 = vrot.slane %v505_v17, 7  ;;  %v512_v24 = vshrl.u32 %v503_v19, 16  ;;  %v515_v25 = vshll.u32 %v503_v19, 16  ;;  %v552_v35 = vrot.slane %v505_v17, 4 }
   0xc   :  { %v479_v28 = vrot.slane %v1222_v21, 1  ;;  %v521_v29 = vrot.slane %v519_v22, 7  ;;  %v553_v36 = vrot.slane %v508_v18, 5  ;;  %v558_v39 = vrot.slane %v519_v22, 4 }
   0xd   :  { %548 = vrot.lane.b32.xlu1 %v495_v14, %s1149_s18  ;;  %v510_v26 = vor.u32 %v508_v18, %v507_v23  ;;  %v514_v27 = vrot.slane %v512_v24, 7  ;;  %v555_v32 = vrot.slane %v512_v24, 4  ;;  %v556_v33 = vrot.slane %v515_v25, 5 }
   0xe   :  { %v524_v34 = vor.u32 %v522_v30, %v521_v29  ;;  %v554_v38 = vor.u32 %v553_v36, %v552_v35  ;;  %v559_v40 = vrot.slane %v522_v30, 5  ;;  %v571_v41 = vrot.slane %v495_v14, 3 }
   0xf   :  { %546 = vrot.lane.b32.xlu0 %v543_v20, %s1149_s18  ;;  %v517_v31 = vor.u32 %v515_v25, %v514_v27  ;;  %v557_v37 = vor.u32 %v556_v33, %v555_v32  ;;  %v1233_v42 = vshll.u32 %v1222_v21, 16  ;;  %v1237_v44 = vshll.u32 %v1213_v13, 16 }
  0x10   :  { %v560_v43 = vor.u32 %v559_v40, %v558_v39  ;;  %v573_v45 = vrot.slane %v502_v15, 3  ;;  %v1241_v46 = vshrl.u32 %v1222_v21, 16  ;;  %v572_v48 = vrot.slane %v503_v19, 3 }
  0x11   :  { %525 = vrot.lane.b32.xlu1 %v510_v26, %s1151_s20  ;;  %v424_v47 = vrot.slane %v1233_v42, 1  ;;  %v1246_v49 = vshrl.u32 %v1213_v13, 16  ;;  %v423_v50 = vrot.slane %v1237_v44, 1  ;;  %v440_v53 = vrot.slane %v1222_v21, 7 }
  0x12   :  { %v449_v54 = vrot.slane %v1241_v46, 5  ;;  %v450_v55 = vrot.slane %v1233_v42, 6  ;;  %v439_v56 = vrot.slane %v1213_v13, 7  ;;  %v447_v58 = vrot.slane %v1237_v44, 6 }
  0x13   :  { %482 = vrot.lane.b32.xlu0 %v479_v28, %s1150_s19  ;;  %v426_v51 = vor.u32 %v424_v47, %v1241_v46  ;;  %v425_v52 = vor.u32 %v423_v50, %v1246_v49  ;;  %v446_v57 = vrot.slane %v1246_v49, 5  ;;  %v468_v63 = vrot.slane %v1241_v46, 2 }
  0x14   :  { %v451_v59 = vor.u32 %v450_v55, %v449_v54  ;;  %v469_v1 = vrot.slane %v1233_v42, 3  ;;  %v459_v2 = vcombine.low %v1213_v13, %v1213_v13  ;;  %v465_v3 = vrot.slane %v1246_v49, 2 }
  0x15   :  { %527 = vrot.lane.b32.xlu1 %v517_v31, %s1151_s20  ;;  %v448_v61 = vor.u32 %v447_v58, %v446_v57  ;;  %v466_v5 = vrot.slane %v1237_v44, 3  ;;  %v377_v7 = vrot.slane %v1241_v46, 6  ;;  %v380_v9 = vrot.slane %v1233_v42, 7 }
  0x16   :  { %v470_v6 = vor.u32 %v469_v1, %v468_v63  ;;  %v369_v15 = vrot.slane %v1246_v49, 6  ;;  %v372_v16 = vrot.slane %v1237_v44, 7  ;;  %v1291_v17 = vrot.slane %v15_v11, %v1204_v10 }
  0x17   :  { %529 = vrot.lane.b32.xlu0 %v524_v34, %s1151_s20  ;;  %v467_v14 = vor.u32 %v466_v5, %v465_v3  ;;  %v381_v18 = vor.u32 %v380_v9, %v377_v7  ;;  %v390_v20 = vrot.slane %v1222_v21, 5  ;;  %v399_v22 = vrot.slane %v1241_v46, 3 }
  0x18   :  { %v373_v19 = vor.u32 %v372_v16, %v369_v15  ;;  %v400_v23 = vrot.slane %v1233_v42, 4  ;;  %v174_v24 = vcombine.high %v1291_v17, %v1291_v17  ;;  %v159_v25 = vcombine.high %v15_v11, %v15_v11 }
  0x19   :  { %563 = vrot.lane.b32.xlu1 %v557_v37, %s1152_s21  ;;  %v389_v26 = vrot.slane %v1213_v13, 5  ;;  %v396_v27 = vrot.slane %v1246_v49, 3  ;;  %v397_v28 = vrot.slane %v1237_v44, 4  ;;  %v409_v29 = vcombine.low %v1201_v8, %v1201_v8 }
  0x1a   :  { %v401_v30 = vor.u32 %v400_v23, %v399_v22  ;;  %v183_v31 = vshrl.u32 %v174_v24, 16  ;;  %v173_v34 = vrot.slane %v159_v25, %v1204_v10  ;;  %v186_v36 = vshll.u32 %v174_v24, 16 }
  0x1b   :  { %561 = vrot.lane.b32.xlu0 %v554_v38, %s1152_s21  ;;  %v398_v32 = vor.u32 %v397_v28, %v396_v27  ;;  %v416_v33 = vrot.slane %v409_v29, %v1204_v10  ;;  %v1316_v39 = vcombine.high %v1209_v12, %v1209_v12  ;;  %v1130_v40 = vpack.i.bf16 %v424_v47, %v423_v50 }
  0x1c   :  { %v185_v35 = vrot.slane %v183_v31, 7  ;;  %v190_v37 = vshrl.u32 %v173_v34, 16  ;;  %v179_v42 = vshll.u32 %v1291_v17, 16  ;;  %v148_v54 = vrot.slane %v1209_v12, 1 }
  0x1d   :  { %574 = vrot.lane.b32.xlu1 %v571_v41, %s1153_s22  ;;  %v417_v8 = vcombine.low %v416_v33, %v416_v33  ;;  %v149_v46 = vrot.slane %v1316_v39, 1  ;;  %v228_v55 = vrot.slane %v183_v31, 4  ;;  %v246_v58 = vrot.slane %v174_v24, 3 }
  0x1e   :  { %v188_v38 = vor.u32 %v186_v36, %v185_v35  ;;  %v192_v41 = vrot.slane %v190_v37, 7  ;;  %v226_v60 = vrot.slane %v179_v42, 5  ;;  %v1341_v63 = vshll.u32 %v1209_v12, 16 }
  0x1f   :  { %565 = vrot.lane.b32.xlu0 %v560_v43, %s1152_s21  ;;  %v193_v43 = vshll.u32 %v173_v34, 16  ;;  %v247_v1 = vrot.slane %v173_v34, 3  ;;  %v106_v3 = vrot.slane %v1316_v39, 7  ;;  %v28_v5 = vshrl.u32 %v1209_v12, 16 }
  0x20   :  { %v36_v7 = vshrl.u32 %v1316_v39, 16  ;;  %v245_v9 = vrot.slane %v1291_v17, 3  ;;  %v114_v22 = vrot.slane %v1341_v63, 6  ;;  %v135_v28 = vrot.slane %v1341_v63, 3 }
  0x21   :  { %578 = vrot.lane.b32.xlu1 %v573_v45, %s1153_s22  ;;  %v207_v45 = vcombine.low %v15_v11, %v15_v11  ;;  %v195_v49 = vor.u32 %v193_v43, %v192_v41  ;;  %v134_v27 = vrot.slane %v28_v5, 2  ;;  %v127_v29 = vcombine.low %v1209_v12, %v1209_v12 }
  0x22   :  { %v116_v15 = vrot.slane %v36_v7, 5  ;;  %v137_v23 = vrot.slane %v36_v7, 2  ;;  %v30_v34 = vrot.slane %v28_v5, 6  ;;  %v33_v35 = vrot.slane %v1341_v63, 7 }
  0x23   :  { %576 = vrot.lane.b32.xlu0 %v572_v48, %s1153_s22  ;;  %v176_v48 = vshrl.u32 %v1291_v17, 16 }
  0x25   :  { %433 = vrot.lane.b32.xlu1 %v426_v51, %s1154_s23  ;;  %v214_v51 = vrot.slane %v207_v45, %v1204_v10  ;;  %v178_v44 = vrot.slane %v176_v48, 7  ;;  %v229_v10 = vrot.slane %v186_v36, 5  ;;  %v52_v36 = vrot.slane %v1316_v39, 5 }
  0x27   :  { %431 = vrot.lane.b32.xlu0 %v425_v52, %s1154_s23  ;;  %v215_v47 = vcombine.high %v214_v51, %v214_v51  ;;  %v181_v50 = vor.u32 %v179_v42, %v178_v44  ;;  %v231_v52 = vrot.slane %v190_v37, 4  ;;  %v230_v57 = vor.u32 %v229_v10, %v228_v55 }
  0x28   :  { %v34_v37 = vor.u32 %v33_v35, %v30_v34 }
  0x29   :  { %443 = vrot.lane.b32.xlu1 %v440_v53, %s1155_s24  ;;  %v232_v53 = vrot.slane %v193_v43, 5  ;;  %v51_v43 = vrot.slane %v1209_v12, 5 }
  0x2b   :  { %441 = vrot.lane.b32.xlu0 %v439_v56, %s1155_s24  ;;  %v233_v56 = vor.u32 %v232_v53, %v231_v52 }
  0x2d   :  { %454 = vrot.lane.b32.xlu1 %v451_v59, %s1156_s25  ;;  %v225_v59 = vrot.slane %v176_v48, 4  ;;  %v59_v48 = vrot.slane %v28_v5, 3 }
  0x2f   :  { %452 = vrot.lane.b32.xlu0 %v448_v61, %s1156_s25  ;;  %v227_v61 = vor.u32 %v226_v60, %v225_v59 }
  0x31   :  { %462 = vrot.lane.b32.xlu1 %v1213_v13, %s1157_s26 }
  0x33   :  { %460 = vrot.lane.b32.xlu0 %v459_v2, %s1157_s26  ;;  %v1345_v2 = vshll.u32 %v1316_v39, 16 }
  0x35   :  { %473 = vrot.lane.b32.xlu1 %v470_v6, %s1158_s29  ;;  %v88_v6 = vrot.slane %v1341_v63, 1  ;;  %v89_v11 = vrot.slane %v1345_v2, 1  ;;  %v117_v16 = vrot.slane %v1345_v2, 6  ;;  %v138_v24 = vrot.slane %v1345_v2, 3 }
  0x36   :  { %v41_v31 = vrot.slane %v1345_v2, 7 }
  0x37   :  { %471 = vrot.lane.b32.xlu0 %v467_v14, %s1158_s29  ;;  %v90_v14 = vor.u32 %v88_v6, %v28_v5 }
  0x39   :  { %384 = vrot.lane.b32.xlu1 %v381_v18, %s1159_s30  ;;  %v91_v18 = vor.u32 %v89_v11, %v36_v7 }
  0x3b   :  { %382 = vrot.lane.b32.xlu0 %v373_v19, %s1159_s30  ;;  %v118_v19 = vor.u32 %v117_v16, %v116_v15 }
  0x3d   :  { %393 = vrot.lane.b32.xlu1 %v390_v20, %s1160_s1  ;;  %v113_v20 = vrot.slane %v28_v5, 5 }
  0x3f   :  { %391 = vrot.lane.b32.xlu0 %v389_v26, %s1160_s1  ;;  %v115_v25 = vor.u32 %v114_v22, %v113_v20  ;;  %v139_v26 = vor.u32 %v138_v24, %v137_v23 }
  0x41   :  { %404 = vrot.lane.b32.xlu1 %v401_v30, %s1161_s4  ;;  %v38_v30 = vrot.slane %v36_v7, 6 }
  0x43   :  { %402 = vrot.lane.b32.xlu0 %v398_v32, %s1161_s4  ;;  %v136_v32 = vor.u32 %v135_v28, %v134_v27  ;;  %v81_v27 = vcombine.low %v1270_v62, %v1270_v62 }
  0x45   :  { %420 = vrot.lane.b32.xlu1 %v416_v33, %s1162_s5  ;;  %v42_v33 = vor.u32 %v41_v31, %v38_v30 }
  0x47   :  { %418 = vrot.lane.b32.xlu0 %v417_v8, %s1162_s5 }
  0x49   :  { %198 = vrot.lane.b32.xlu1 %v188_v38, %s1151_s20  ;;  %v62_v38 = vrot.slane %v36_v7, 3 }
  0x4b   :  { %1131 = vrot.lane.b32.xlu0 %v1130_v40, %s1154_s23  ;;  %v63_v40 = vrot.slane %v1345_v2, 4 }
  0x4d   :  { %152 = vrot.lane.b32.xlu1 %v149_v46, %s1150_s19  ;;  %v64_v46 = vor.u32 %v63_v40, %v62_v38 }
  0x4f   :  { %200 = vrot.lane.b32.xlu0 %v195_v49, %s1151_s20  ;;  %v60_v49 = vrot.slane %v1341_v63, 4 }
  0x51   :  { %220 = vrot.lane.b32.xlu1 %v1291_v17, %s1149_s18  ;;  %v105_v17 = vrot.slane %v1209_v12, 7  ;;  %v61_v42 = vor.u32 %v60_v49, %v59_v48 }
  0x53   :  { %218 = vrot.lane.b32.xlu0 %v215_v47, %s1149_s18 }
  0x55   :  { %196 = vrot.lane.b32.xlu1 %v181_v50, %s1151_s20 }
  0x57   :  { %150 = vrot.lane.b32.xlu0 %v148_v54, %s1150_s19 }
  0x59   :  { %238 = vrot.lane.b32.xlu1 %v233_v56, %s1152_s21 }
  0x5b   :  { %236 = vrot.lane.b32.xlu0 %v230_v57, %s1152_s21 }
  0x5d   :  { %250 = vrot.lane.b32.xlu1 %v246_v58, %s1153_s22 }
  0x5f   :  { %216 = vrot.lane.b32.xlu0 %v214_v51, %s1149_s18 }
  0x61   :  { %234 = vrot.lane.b32.xlu1 %v227_v61, %s1152_s21 }
  0x63   :  { %252 = vrot.lane.b32.xlu0 %v247_v1, %s1153_s22 }
  0x65   :  { %109 = vrot.lane.b32.xlu1 %v106_v3, %s1155_s24 }
  0x67   :  { %248 = vrot.lane.b32.xlu0 %v245_v9, %s1153_s22 }
  0x69   :  { %96 = vrot.lane.b32.xlu1 %v90_v14, %s1154_s23 }
  0x6b   :  { %98 = vrot.lane.b32.xlu0 %v91_v18, %s1154_s23 }
  0x6d   :  { %121 = vrot.lane.b32.xlu1 %v118_v19, %s1156_s25 }
  0x6f   :  { %107 = vrot.lane.b32.xlu0 %v105_v17, %s1155_s24 }
  0x71   :  { %130 = vrot.lane.b32.xlu1 %v1209_v12, %s1157_s26 }
  0x73   :  { %119 = vrot.lane.b32.xlu0 %v115_v25, %s1156_s25 }
  0x75   :  { %142 = vrot.lane.b32.xlu1 %v139_v26, %s1158_s29  ;;  %v1135_v26 = vpack.i.bf16 %v88_v6, %v89_v11 }
  0x77   :  { %128 = vrot.lane.b32.xlu0 %v127_v29, %s1157_s26 }
  0x79   :  { %140 = vrot.lane.b32.xlu1 %v136_v32, %s1158_s29 }
  0x7b   :  { %v545_v8 = vpop.permute.xlu1 %544  ;;  %45 = vrot.lane.b32.xlu0 %v42_v33, %s1159_s30 }
  0x7d   :  { %v481_v41 = vpop.permute.xlu0 %480  ;;  %55 = vrot.lane.b32.xlu1 %v52_v36, %s1160_s1 }
  0x7f   :  { %v549_v45 = vpop.permute.xlu1 %548  ;;  %43 = vrot.lane.b32.xlu0 %v34_v37, %s1159_s30 }
  0x81   :  { %v547_v51 = vpop.permute.xlu0 %546  ;;  %53 = vrot.lane.b32.xlu1 %v51_v43, %s1160_s1 }
  0x82   :  { %v550_v9 = vsel %vm1823_vm8, %v545_v8, %v547_v51  ;;  %v551_v14 = vsel %vm1823_vm8, %v547_v51, %v549_v45  ;;  %vm1834_vm8 = vcmask 916480  }
  0x83   :  { %v526_v44 = vpop.permute.xlu1 %525  ;;  %67 = vrot.lane.b32.xlu0 %v64_v46, %s1161_s4 }
  0x85   :  { %v1389_v47 = vpop.permute.xlu0 %482  ;;  %84 = vrot.lane.b32.xlu1 %v1270_v62, %s1162_s5 }
  0x86   :  { %v1403_v58 = vsel %vm1824_vm3, %v481_v41, %v1389_v47  ;;  %vm1829_vm3 = vcmask 891904  }
  0x87   :  { %v528_v50 = vpop.permute.xlu1 %527  ;;  %65 = vrot.lane.b32.xlu0 %v61_v42, %s1161_s4 }
  0x88   :  { %v531_v10 = vsel %vm1825_vm0, %v526_v44, %v528_v50 }
  0x89   :  { %v530_v52 = vpop.permute.xlu0 %529  ;;  %v630_v60 = vsel %vm1395_vm4, %v1403_v58, %v531_v10 }
  0x8a   :  { %v532_v56 = vsel %vm1825_vm0, %v528_v50, %v530_v52  ;;  %v634_v16 = vsel %vm1833_vm9, %v630_v60, %v550_v9  ;;  %vm1448_vm0 = vmand %vm276_vm2, %vm314_vm7  ;;  %vm258_vm7 = vsmask.f32 1280 }
  0x8b   :  { %v564_v53 = vpop.permute.xlu1 %563  ;;  %v631_v61 = vsel %vm1395_vm4, %v1389_v47, %v532_v56 }
  0x8c   :  { %v638_v18 = vsel %vm1833_vm9, %v631_v61, %v551_v14 }
  0x8d   :  { %v562_v54 = vpop.permute.xlu0 %561 }
  0x8e   :  { %v567_v1 = vsel %vm1822_vm5, %v562_v54, %v564_v53 }
  0x8f   :  { %v575_v57 = vpop.permute.xlu1 %574  ;;  %v640_v20 = vsel %vm1414_vm11, %v634_v16, %v567_v1 }
  0x91   :  { %v566_v59 = vpop.permute.xlu0 %565 }
  0x92   :  { %v568_v3 = vsel %vm1822_vm5, %v564_v53, %v566_v59  ;;  %vm1830_vm5 = vcmask 900096  }
  0x93   :  { %v579_v5 = vpop.permute.xlu1 %578  ;;  %v641_v22 = vsel %vm1414_vm11, %v638_v18, %v568_v3 }
  0x95   :  { %v577_v15 = vpop.permute.xlu0 %576 }
  0x96   :  { %v580_v19 = vsel %vm1821_vm10, %v575_v57, %v577_v15  ;;  %v581_v17 = vsel %vm1821_vm10, %v577_v15, %v579_v5  ;;  %vm1442_vm10 = vmand %vm1838_vm13, %vm300_vm14  ;;  %vm1832_vm14 = vcmask 1046528  }
  0x97   :  { %v434_v23 = vpop.permute.xlu1 %433  ;;  %v644_v24 = vsel %vm271_vm12, %v640_v20, %v580_v19  ;;  %v647_v25 = vsel %vm271_vm12, %v641_v22, %v581_v17 }
  0x98   :  { %662 = vrot.lane.b32.xlu1 %v644_v24, %s1150_s19  ;;  %664 = vrot.lane.b32.xlu0 %v647_v25, %s1150_s19 }
  0x99   :  { %v432_v28 = vpop.permute.xlu0 %431 }
  0x9a   :  { %v436_v36 = vsel %vm1834_vm8, %v432_v28, %v434_v23 }
  0x9b   :  { %v444_v29 = vpop.permute.xlu1 %443 }
  0x9c   :  { %1136 = vrot.lane.b32.xlu1 %v1135_v26, %s1154_s23  ;;  %82 = vrot.lane.b32.xlu0 %v81_v27, %s1162_s5  ;;  %v610_v63 = vsel %vm1831_vm1, %v434_v23, %v444_v29 }
  0x9d   :  { %v442_v30 = vpop.permute.xlu0 %441 }
  0x9e   :  { %v445_v6 = vsel %vm1826_vm15, %v442_v30, %v444_v29  ;;  %vm1828_vm15 = vcmask 883712  }
  0x9f   :  { %v455_v31 = vpop.permute.xlu1 %454  ;;  %v606_v40 = vsel %vm1831_vm1, %v436_v36, %v445_v6  ;;  %vm1837_vm1 = vcmask 1022976  }
  0xa0   :  { %v613_v34 = vsel %vm1442_vm10, %v610_v63, %v455_v31 }
  0xa1   :  { %v453_v32 = vpop.permute.xlu0 %452 }
  0xa2   :  { %v456_v35 = vsel %vm1830_vm5, %v453_v32, %v455_v31  ;;  %vm272_vm5 = vsmask.f32 4352 }
  0xa3   :  { %v463_v62 = vpop.permute.xlu1 %462  ;;  %v612_v43 = vsel %vm1442_vm10, %v606_v40, %v456_v35  ;;  %vm1487_vm8 = vmand %vm271_vm12, %vm272_vm5  ;;  %vm1853_vm5 = vcmask 916480  }
  0xa4   :  { %v620_v8 = vsel %vm1827_vm6, %v613_v34, %v463_v62 }
  0xa5   :  { %v461_v11 = vpop.permute.xlu0 %460 }
  0xa6   :  { %v464_v37 = vsel %vm1829_vm3, %v461_v11, %v463_v62  ;;  %vm57_vm3 = vcmask 1031168  }
  0xa7   :  { %v474_v38 = vpop.permute.xlu1 %473  ;;  %v616_v48 = vsel %vm1827_vm6, %v612_v43, %v464_v37  ;;  %vm1835_vm6 = vcmask 1039360  }
  0xa8   :  { %v623_v41 = vsel %vm1448_vm0, %v620_v8, %v474_v38 }
  0xa9   :  { %v472_v45 = vpop.permute.xlu0 %471  ;;  %v629_v46 = vsel %vm1832_vm14, %v623_v41, %v1389_v47 }
  0xaa   :  { %v475_v49 = vsel %vm1828_vm15, %v472_v45, %v474_v38  ;;  %660 = vrot.lane.b32.xlu1 %v629_v46, %s1150_s19  ;;  %vm1474_vm15 = vmand %vm1833_vm9, %vm258_vm7  ;;  %vm1836_vm7 = vcmask 1014784   ;;  %vm286_vm9 = vsmask.f32 7424 }
  0xab   :  { %v385_v51 = vpop.permute.xlu1 %384  ;;  %v622_v44 = vsel %vm1448_vm0, %v616_v48, %v475_v49 }
  0xac   :  { %v626_v42 = vsel %vm1832_vm14, %v622_v44, %v1403_v58  ;;  %v583_v57 = vsel %vm1474_vm15, %v1222_v21, %v385_v51  ;;  %v1163_v58 = vmov 0   ;;  %vm285_vm14 = vcmask 1047552   ;;  %v1146_v21 = vld [vmem:[%s1818_s0] sm:$0xff]  }
  0xad   :  { %v383_v50 = vpop.permute.xlu0 %382  ;;  %658 = vrot.lane.b32.xlu0 %v626_v42, %s1150_s19  ;;  %801 = vmatprep.mubr.bf16.mxu1 %v1163_v58 }
  0xae   :  { %748 = vmatprep.mubr.bf16.mxu0 %v1163_v58  ;;  %v386_v60 = vsel %vm1835_vm6, %v383_v50, %v385_v51  ;;  %vm1496_vm6 = vmand %vm285_vm14, %vm286_vm9  ;;  %vm1854_vm9 = vcmask 777216  }
  0xaf   :  { %v394_v52 = vpop.permute.xlu1 %393  ;;  %v582_v9 = vsel %vm1474_vm15, %v1213_v13, %v386_v60  ;;  %vm1855_vm14 = vmmov %vm1854_vm9 }
  0xb0   :  { %v590_v61 = vsel %vm1838_vm13, %v583_v57, %v394_v52 }
  0xb1   :  { %v392_v53 = vpop.permute.xlu0 %391 }
  0xb2   :  { %v395_v1 = vsel %vm57_vm3, %v392_v53, %v394_v52 }
  0xb3   :  { %v405_v54 = vpop.permute.xlu1 %404  ;;  %v586_v18 = vsel %vm1838_vm13, %v582_v9, %v395_v1 }
  0xb4   :  { %v593_v19 = vsel %vm1487_vm8, %v590_v61, %v405_v54 }
  0xb5   :  { %v403_v47 = vpop.permute.xlu0 %402 }
  0xb6   :  { %v406_v5 = vsel %vm1837_vm1, %v403_v47, %v405_v54 }
  0xb7   :  { %v421_v56 = vpop.permute.xlu1 %420  ;;  %v592_v22 = vsel %vm1487_vm8, %v586_v18, %v406_v5 }
  0xb8   :  { %v600_v23 = vsel %vm276_vm2, %v593_v19, %v421_v56 }
  0xb9   :  { %v419_v59 = vpop.permute.xlu0 %418 }
  0xba   :  { %v422_v14 = vsel %vm1836_vm7, %v419_v59, %v421_v56  ;;  %vm1857_vm7 = vcmask 769024  }
  0xbb   :  { %v199_v3 = vpop.permute.xlu1 %198  ;;  %v596_v26 = vsel %vm276_vm2, %v592_v22, %v422_v14  ;;  %vm1858_vm1 = vmmov %vm1857_vm7 }
  0xbd   :  { %v1132_v15 = vpop.permute.xlu0 %1131 }
  0xbe   :  { %v1134_v17 = vunpack.i.h.bf16 %v1132_v15  ;;  %v1133_v20 = vunpack.i.l.bf16 %v1132_v15  ;;  %v1164_v15 = vmov 65535  }
  0xbf   :  { %v1506_v13 = vpop.permute.xlu1 %152  ;;  %v704_v18 = vsel %vm276_vm2, 4294967295, %v1164_v15  ;;  %v1147_v15 = vld [vmem:[%s1818_s0 + $0x8] sm:$0xff]  }
  0xc0   :  { %v603_v24 = vsel %vm1496_vm6, %v600_v23, %v1134_v17  ;;  %v435_v25 = vsel %vm1853_vm5, %v1133_v20, %v1134_v17  ;;  %vm1856_vm5 = vcmask 785408  }
  0xc1   :  { %656 = vrot.lane.b32.xlu1 %v603_v24, %s1150_s19  ;;  %v201_v27 = vpop.permute.xlu0 %200  ;;  %v602_v28 = vsel %vm1496_vm6, %v596_v26, %v435_v25 }
  0xc2   :  { %654 = vrot.lane.b32.xlu0 %v602_v28, %s1150_s19  ;;  %v204_v50 = vsel %vm1854_vm9, %v199_v3, %v201_v27  ;;  %vm1859_vm9 = vcmask 1041408  }
  0xc3   :  { %v221_v29 = vpop.permute.xlu1 %220  ;;  %v330_v56 = vsel %vm1395_vm4, %v1506_v13, %v204_v50  ;;  %vm1861_vm13 = vmmov %vm1859_vm9 }
  0xc5   :  { %v219_v30 = vpop.permute.xlu0 %218 }
  0xc6   :  { %v224_v57 = vsel %vm1857_vm7, %v219_v30, %v221_v29  ;;  %vm1866_vm7 = vcmask 785408  }
  0xc7   :  { %v197_v31 = vpop.permute.xlu1 %196  ;;  %v338_v61 = vsel %vm1859_vm9, %v330_v56, %v224_v57  ;;  %vm1867_vm9 = vmmov %vm1866_vm7 }
  0xc8   :  { %v203_v52 = vsel %vm1855_vm14, %v197_v31, %v199_v3  ;;  %vm1860_vm14 = vcmask 760832  }
  0xc9   :  { %v151_v32 = vpop.permute.xlu0 %150 }
  0xca   :  { %v155_v53 = vsel %vm1856_vm5, %v151_v32, %v1506_v13  ;;  %vm1862_vm5 = vmmov %vm1860_vm14 }
  0xcb   :  { %v239_v63 = vpop.permute.xlu1 %238  ;;  %v329_v59 = vsel %vm1395_vm4, %v155_v53, %v203_v52 }
  0xcd   :  { %v237_v62 = vpop.permute.xlu0 %236 }
  0xce   :  { %v242_v1 = vsel %vm1860_vm14, %v237_v62, %v239_v63  ;;  %vm1869_vm14 = vcmask 908288  }
  0xcf   :  { %v251_v6 = vpop.permute.xlu1 %250  ;;  %v344_v19 = vsel %vm1414_vm11, %v338_v61, %v242_v1 }
  0xd1   :  { %v217_v11 = vpop.permute.xlu0 %216 }
  0xd2   :  { %v223_v60 = vsel %vm1858_vm1, %v217_v11, %v219_v30  ;;  %vm1863_vm1 = vcmask 752640  }
  0xd3   :  { %v235_v34 = vpop.permute.xlu1 %234  ;;  %v334_v3 = vsel %vm1861_vm13, %v329_v59, %v223_v60  ;;  %vm1864_vm4 = vmmov %vm1863_vm1  ;;  %vm1865_vm13 = vcmask 1046528  }
  0xd4   :  { %v241_v5 = vsel %vm1862_vm5, %v235_v34, %v237_v62  ;;  %v705_v24 = vsel %vm1865_vm13, %v704_v18, 0  ;;  %vm1870_vm5 = vcmask 1040384   ;;  %vm1874_vm13 = vcmask 1043456  }
  0xd5   :  { %v253_v35 = vpop.permute.xlu0 %252  ;;  %v343_v55 = vsel %vm1414_vm11, %v334_v3, %v241_v5  ;;  %vm1868_vm11 = vcmask 916480  }
  0xd6   :  { %v256_v17 = vsel %vm1863_vm1, %v251_v6, %v253_v35  ;;  %vm1871_vm1 = vmmov %vm1870_vm5 }
  0xd7   :  { %v110_v36 = vpop.permute.xlu1 %109  ;;  %v351_v25 = vsel %vm271_vm12, %v344_v19, %v256_v17 }
  0xd9   :  { %v249_v8 = vpop.permute.xlu0 %248 }
  0xda   :  { %v255_v20 = vsel %vm1864_vm4, %v249_v8, %v251_v6  ;;  %vm1873_vm4 = vcmask 891904  }
  0xdb   :  { %v97_v37 = vpop.permute.xlu1 %96  ;;  %v348_v26 = vsel %vm271_vm12, %v343_v55, %v255_v20  ;;  %vm1872_vm12 = vcmask 900096  }
  0xdc   :  { %v706_v31 = vand.u32 %v705_v24, %v348_v26 }
  0xdd   :  { %v99_v38 = vpop.permute.xlu0 %98 }
  0xde   :  { %v102_v32 = vsel %vm1868_vm11, %v97_v37, %v99_v38  ;;  %v297_v62 = vsel %vm1870_vm5, %v99_v38, %v110_v36  ;;  %vm1878_vm11 = vcmask 785408  }
  0xdf   :  { %v122_v40 = vpop.permute.xlu1 %121 }
  0xe0   :  { %v303_v34 = vsel %vm1442_vm10, %v297_v62, %v122_v40 }
  0xe1   :  { %v108_v41 = vpop.permute.xlu0 %107 }
  0xe2   :  { %v112_v63 = vsel %vm1869_vm14, %v108_v41, %v110_v36  ;;  %vm1879_vm14 = vmmov %vm1878_vm11 }
  0xe3   :  { %v131_v43 = vpop.permute.xlu1 %130  ;;  %v293_v6 = vsel %vm1871_vm1, %v102_v32, %v112_v63  ;;  %vm1881_vm1 = vcmask 1039360  }
  0xe4   :  { %v311_v52 = vsel %vm1874_vm13, %v303_v34, %v131_v43 }
  0xe5   :  { %v120_v45 = vpop.permute.xlu0 %119 }
  0xe6   :  { %v124_v11 = vsel %vm1872_vm12, %v120_v45, %v122_v40 }
  0xe7   :  { %v143_v46 = vpop.permute.xlu1 %142  ;;  %v302_v8 = vsel %vm1442_vm10, %v293_v6, %v124_v11  ;;  %vm1877_vm10 = vcmask 1046528  }
  0xe8   :  { %v317_v38 = vsel %vm1448_vm0, %v311_v52, %v143_v46  ;;  %vm1880_vm5 = vmmov %vm1877_vm10 }
  0xe9   :  { %v129_v48 = vpop.permute.xlu0 %128  ;;  %v325_v2 = vsel %vm1877_vm10, %v317_v38, %v1506_v13  ;;  %vm879_vm10 = vcmask 522240  }
  0xea   :  { %v133_v50 = vsel %vm1873_vm4, %v129_v48, %v131_v43  ;;  %vm1884_vm4 = vcmask 1022976  }
  0xeb   :  { %v141_v51 = vpop.permute.xlu1 %140 }
  0xed   :  { %v1516_v49 = vpop.permute.xlu0 %45 }
  0xee   :  { %v261_v33 = vsel %vm1474_vm15, %v1316_v39, %v1516_v49 }
  0xef   :  { %v1518_v44 = vpop.permute.xlu1 %55 }
  0xf1   :  { %v1520_v42 = vpop.permute.xlu0 %43 }
  0xf3   :  { %v54_v54 = vpop.permute.xlu1 %53 }
  0xf4   :  { %v58_v57 = vsel %vm57_vm3, %v54_v54, %v1518_v44  ;;  %vm1886_vm3 = vcmask 916480  }
  0xf5   :  { %v1526_v47 = vpop.permute.xlu0 %67 }
  0xf7   :  { %v85_v9 = vpop.permute.xlu1 %84 }
  0xf9   :  { %v66_v14 = vpop.permute.xlu0 %65 }
 0x10a   :  { %v663_v22 = vpop.permute.xlu1 %662  ;;  %v665_v23 = vpop.permute.xlu0 %664 }
 0x10b   :  { %v668_v27 = vsel %vm1866_vm7, %v663_v22, %v665_v23  ;;  %v714_v28 = vand.u32 %v705_v24, %v665_v23  ;;  %v682_v29 = vsel %vm1867_vm9, %v351_v25, %v663_v22  ;;  %vm1875_vm7 = vmmov %vm1874_vm13  ;;  %vm1876_vm9 = vcmask 883712  }
 0x10c   :  { %v708_v30 = vand.u32 %v705_v24, %v682_v29  ;;  %v711_v7 = vand.u32 %v705_v24, %v668_v27  ;;  %v307_v41 = vsel %vm1875_vm7, %v302_v8, %v133_v50  ;;  %v145_v36 = vsel %vm1876_vm9, %v141_v51, %v143_v46  ;;  %vm1887_vm13 = vmmov %vm1878_vm11 }
 0x10d   :  { %779 = vmatprep.subr.bf16.mxu1 %v714_v28  ;;  %v316_v40 = vsel %vm1448_vm0, %v307_v41, %v145_v36  ;;  %v48_v46 = vsel %vm1881_vm1, %v1520_v42, %v1516_v49  ;;  %vm1882_vm0 = vcmask 1042432   ;;  %v70_v42 = vsel %vm1884_vm4, %v66_v14, %v1526_v47  ;;  %vm1888_vm7 = vmmov %vm1878_vm11 }
 0x10e   :  { %726 = vmatprep.subr.bf16.mxu0 %v708_v30  ;;  %780 = vmatpush1.bf16.msra.mxu1 %v711_v7  ;;  %v1137_v35 = vpop.permute.xlu1 %1136  ;;  %v83_v37 = vpop.permute.xlu0 %82  ;;  %v321_v51 = vsel %vm1880_vm5, %v316_v40, %v155_v53  ;;  %v260_v13 = vsel %vm1474_vm15, %v1209_v12, %v48_v46  ;;  %v269_v53 = vsel %vm1882_vm0, %v261_v33, %v1518_v44  ;;  %vm1883_vm12 = vmmov %vm1882_vm0  ;;  %vm1885_vm15 = vcmask 1014784  }
 0x10f   :  { %727 = vmatpush1.bf16.msra.mxu0 %v706_v31  ;;  %v265_v59 = vsel %vm1883_vm12, %v260_v13, %v58_v57  ;;  %v275_v60 = vsel %vm1487_vm8, %v269_v53, %v1526_v47  ;;  %v1139_v39 = vunpack.i.h.bf16 %v1137_v35  ;;  %v1138_v49 = vunpack.i.l.bf16 %v1137_v35  ;;  %vm1892_vm1 = vmmov %vm1880_vm5 }
 0x110   :  { %v274_v12 = vsel %vm1487_vm8, %v265_v59, %v70_v42  ;;  %v87_v10 = vsel %vm1885_vm15, %v83_v37, %v85_v9  ;;  %v283_v54 = vsel %vm276_vm2, %v275_v60, %v85_v9  ;;  %vm697_vm8 = vcmask 367616   ;;  %vm1893_vm0 = vmmov %vm1892_vm1 }
 0x111   :  { %v101_v44 = vsel %vm1886_vm3, %v1139_v39, %v1138_v49  ;;  %v279_v1 = vsel %vm276_vm2, %v274_v12, %v87_v10  ;;  %v289_v5 = vsel %vm1496_vm6, %v283_v54, %v1138_v49  ;;  %vm873_vm2 = vcmask 523264  }
 0x112   :  { %v288_v9 = vsel %vm1496_vm6, %v279_v1, %v101_v44  ;;  %vm1889_vm6 = vmmov %vm1888_vm7 }
 0x113   :  { %vm1890_vm9 = vmmov %vm1889_vm6 }
 0x11c   :  { %v661_v45 = vpop.permute.xlu1 %660 }
 0x11d   :  { %781 = vmatprep.subr.bf16.mxu1 %v661_v45 }
 0x11f   :  { %v659_v56 = vpop.permute.xlu0 %658 }
 0x120   :  { %v679_v48 = vsel %vm1878_vm11, %v325_v2, %v659_v56  ;;  %v667_v43 = vsel %vm1879_vm14, %v659_v56, %v661_v45  ;;  %vm1891_vm11 = vmmov %vm1889_vm6  ;;  %vm994_vm14 = vcmask 784384  }
 0x121   :  { %728 = vmatprep.subr.bf16.mxu0 %v679_v48  ;;  %782 = vmatpush1.bf16.msra.mxu1 %v667_v43 }
 0x122   :  { %729 = vmatpush1.bf16.msra.mxu0 %v321_v51 }
 0x133   :  { %v657_v61 = vpop.permute.xlu1 %656 }
 0x134   :  { %783 = vmatprep.subr.bf16.mxu1 %v657_v61  ;;  %v655_v3 = vpop.permute.xlu0 %654 }
 0x135   :  { %v676_v47 = vsel %vm1887_vm13, %v289_v5, %v655_v3  ;;  %v666_v14 = vsel %vm1888_vm7, %v655_v3, %v657_v61 }
 0x136   :  { %730 = vmatprep.subr.bf16.mxu0 %v676_v47  ;;  %784 = vmatpush1.bf16.msra.mxu1 %v666_v14 }
 0x137   :  { %731 = vmatpush1.bf16.msra.mxu0 %v288_v9 }
 0x139   :  { %1101 = vmatmul.mubr.msk.bf16.vlgmr.msra.gmra.mxu1 %vm697_vm8, %v1146_v21 }
 0x13a   :  { %1099 = vmatmul.mubr.msk.bf16.vlgmr.msra.gmra.mxu0 %vm697_vm8, %v1146_v21  ;;  %811 = vmatprep.mubr.bf16.mxu1 %v1163_v58 }
 0x13b   :  { %758 = vmatprep.mubr.bf16.mxu0 %v1163_v58 }
 0x141   :  { %1102 = vmatmul.mubr.msk.bf16.gmra.mxu1 %vm697_vm8, %v1147_v15 }
 0x142   :  { %1100 = vmatmul.mubr.msk.bf16.gmra.mxu0 %vm697_vm8, %v1147_v15 }
 0x1f9   :  { %v803_v18 = vpop.f32.mrf.mxu1 }
 0x1fa   :  { %v1613_v19 = vmax.f32 %v803_v18, 0.0  ;;  %v750_v55 = vpop.f32.mrf.mxu0 }
 0x1fb   :  { %v1615_v16 = vmax.f32 %v750_v55, 0.0  ;;  %v805_v17 = vpop.f32.mrf.mxu1 }
 0x1fc   :  { %v1617_v20 = vmax.f32 %v805_v17, 0.0  ;;  %1010 = vrot.lane.b32.xlu1 %v1613_v19, %s1165_s10  ;;  %v752_v58 = vpop.f32.mrf.mxu0 }
 0x1fd   :  { %987 = vst [vmem:[%s1819_s2] sm:$0xff] %v1615_v16  ;;  %v1625_v22 = vmax.f32 %v752_v58, 0.0  ;;  %v807_v23 = vpop.f32.mrf.mxu1 }
 0x1fe   :  { %1012 = vrot.lane.b32.xlu0 %v1617_v20, %s1165_s10  ;;  %v754_v24 = vpop.f32.mrf.mxu0  ;;  %v1638_v29 = vmax.f32 %v807_v23, 0.0  ;;  %v874_v52 = vsel %vm873_vm2, %v1617_v20, -inf  ;;  %v1729_v23 = vadd.s32 8, %v1191_v4 }
 0x1ff   :  { %988 = vst.msk [vmem:[%s1819_s2 + $0x8] sm:$0xff] %vm1889_vm6, %v1625_v22  ;;  %v1634_v25 = vmax.f32 %v754_v24, 0.0  ;;  %v809_v26 = vpop.f32.mrf.mxu1  ;;  %v1732_v24 = vadd.s32 16, %v1191_v4 }
 0x200   :  { %v1636_v27 = vmax.f32 %v809_v26, 0.0  ;;  %v756_v28 = vpop.f32.mrf.mxu0  ;;  %v863_v35 = vmax.f32 %v1613_v19, %v1638_v29 }
 0x201   :  { %989 = vst [vmem:[%s1819_s2 + $0x10] sm:$0xff] %v1634_v25  ;;  %v1644_v30 = vmax.f32 %v756_v28, 0.0  ;;  %v813_v7 = vpop.f32.mrf.mxu1  ;;  %v843_v37 = vmax.f32 %v1615_v16, %v1634_v25 }
 0x202   :  { %1018 = vrot.lane.b32.xlu1 %v1636_v27, %s1165_s10  ;;  %1008 = vrot.lane.b32.xlu0 %v1625_v22, %s1165_s10  ;;  %v760_v31 = vpop.f32.mrf.mxu0  ;;  %v1655_v32 = vmax.f32 %v813_v7, 0.0  ;;  %v875_v6 = vsel %vm873_vm2, %v1636_v27, -inf  ;;  %v1735_v7 = vadd.s32 24, %v1191_v4 }
 0x203   :  { %990 = vst.msk [vmem:[%s1819_s2 + $0x18] sm:$0xff] %vm1890_vm9, %v1644_v30  ;;  %v1657_v63 = vmax.f32 %v760_v31, 0.0  ;;  %v815_v62 = vpop.f32.mrf.mxu1  ;;  %v876_v45 = vmax.f32 %v874_v52, %v875_v6  ;;  %v853_v48 = vmax.f32 %v1625_v22, %v1644_v30 }
 0x204   :  { %v1661_v11 = vmax.f32 %v815_v62, 0.0  ;;  %v762_v34 = vpop.f32.mrf.mxu0  ;;  %v864_v40 = vmax.f32 %v863_v35, %v1655_v32 }
 0x205   :  { %991 = vst [vmem:[%s1819_s2 + $0x20] sm:$0xff] %v1657_v63  ;;  %v1669_v8 = vmax.f32 %v762_v34, 0.0  ;;  %v817_v50 = vpop.f32.mrf.mxu1  ;;  %v844_v43 = vmax.f32 %v843_v37, %v1657_v63 }
 0x206   :  { %v877_v41 = vsel %vm873_vm2, %v1661_v11, -inf  ;;  %v1677_v36 = vmax.f32 %v817_v50, 0.0  ;;  %1016 = vrot.lane.b32.xlu0 %v1638_v29, %s1165_s10  ;;  %1014 = vrot.lane.b32.xlu1 %v1644_v30, %s1165_s10  ;;  %v764_v38 = vpop.f32.mrf.mxu0 }
 0x207   :  { %992 = vst.msk [vmem:[%s1819_s2 + $0x28] sm:$0xff] %vm1891_vm11, %v1669_v8  ;;  %v1689_v56 = vmax.f32 %v764_v38, 0.0  ;;  %v819_v2 = vpop.f32.mrf.mxu1  ;;  %v878_v13 = vmax.f32 %v876_v45, %v877_v41  ;;  %v854_v42 = vmax.f32 %v853_v48, %v1669_v8 }
 0x208   :  { %v865_v51 = vsel %vm1880_vm5, %v1677_v36, -inf  ;;  %v1696_v46 = vmax.f32 %v819_v2, 0.0  ;;  %v766_v33 = vpop.f32.mrf.mxu0  ;;  %vm1894_vm5 = vmmov %vm1893_vm0 }
 0x209   :  { %v866_v57 = vmax.f32 %v864_v40, %v865_v51  ;;  %v845_v53 = vsel %vm1892_vm1, %v1689_v56, -inf  ;;  %993 = vst [vmem:[%s1819_s2 + $0x30] sm:$0x7f] %v1689_v56  ;;  %v1704_v59 = vmax.f32 %v766_v33, 0.0 }
 0x20a   :  { %v846_v60 = vmax.f32 %v844_v43, %v845_v53  ;;  %v880_v39 = vsel %vm879_vm10, %v1696_v46, -inf  ;;  %1024 = vrot.lane.b32.xlu0 %v1661_v11, %s1165_s10  ;;  %1022 = vrot.lane.b32.xlu1 %v1655_v32, %s1165_s10 }
 0x20b   :  { %v867_v49 = vrot.slane %v866_v57, 4  ;;  %v881_v12 = vmax.f32 %v878_v13, %v880_v39  ;;  %v855_v10 = vsel %vm1893_vm0, %v1704_v59, -inf  ;;  %995 = vst.msk [vmem:[%s1819_s2 + $0x38] sm:$0x7f] %vm994_vm14, %v1704_v59 }
 0x20c   :  { %v847_v54 = vrot.slane %v846_v60, 4  ;;  %v856_v61 = vmax.f32 %v854_v42, %v855_v10 }
 0x20d   :  { %v868_v44 = vmax.f32 %v866_v57, %v867_v49  ;;  %v882_v1 = vrot.slane %v881_v12, 4 }
 0x20e   :  { %v848_v3 = vmax.f32 %v846_v60, %v847_v54  ;;  %v857_v5 = vrot.slane %v856_v61, 4  ;;  %1020 = vrot.lane.b32.xlu0 %v1669_v8, %s1165_s10  ;;  %1026 = vrot.lane.b32.xlu1 %v1704_v59, %s1165_s10 }
 0x20f   :  { %v869_v47 = vrot.slane %v868_v44, 2  ;;  %v883_v14 = vmax.f32 %v881_v12, %v882_v1 }
 0x210   :  { %v849_v21 = vrot.slane %v848_v3, 2  ;;  %v858_v9 = vmax.f32 %v856_v61, %v857_v5 }
 0x211   :  { %v870_v15 = vmax.f32 %v868_v44, %v869_v47  ;;  %v884_v18 = vrot.slane %v883_v14, 2 }
 0x212   :  { %v850_v55 = vmax.f32 %v848_v3, %v849_v21  ;;  %v859_v17 = vrot.slane %v858_v9, 2  ;;  %1028 = vrot.lane.b32.xlu0 %v1677_v36, %s1165_s10  ;;  %1030 = vrot.lane.b32.xlu1 %v1696_v46, %s1165_s10 }
 0x213   :  { %v871_v58 = vrot.slane %v870_v15, 1  ;;  %v885_v28 = vmax.f32 %v883_v14, %v884_v18  ;;  %v1166_v18 = vmov 1966171168  }
 0x214   :  { %v851_v26 = vrot.slane %v850_v55, 1  ;;  %v860_v6 = vmax.f32 %v858_v9, %v859_v17 }
 0x215   :  { %v872_v31 = vmax.f32 %v870_v15, %v871_v58  ;;  %v886_v52 = vrot.slane %v885_v28, 1 }
 0x216   :  { %v852_v62 = vmax.f32 %v850_v55, %v851_v26  ;;  %v1061_v55 = vunpack.c.l.s4 %v1166_v18 }
 0x217   :  { %vm890_vm12 = vcmp.eq.f32.partialorder %v1613_v19, %v872_v31  ;;  %vm894_vm4 = vcmp.eq.f32.partialorder %v1638_v29, %v872_v31  ;;  %vm898_vm15 = vcmp.eq.f32.partialorder %v1655_v32, %v872_v31  ;;  %vm902_vm3 = vcmp.eq.f32.partialorder %v1677_v36, %v872_v31 }
 0x218   :  { %v906_v34 = vsel %vm890_vm12, %v1191_v4, 31  ;;  %v910_v35 = vsel %vm894_vm4, %v1729_v23, 31  ;;  %v914_v50 = vsel %vm898_vm15, %v1732_v24, 31  ;;  %v918_v37 = vsel %vm902_vm3, %v1735_v7, 31  ;;  %vm1895_vm12 = vmmov %vm1894_vm5 }
 0x219   :  { %vm952_vm13 = vcmp.lt.s32.totalorder %v906_v34, %v910_v35  ;;  %vm888_vm7 = vcmp.eq.f32.partialorder %v1615_v16, %v852_v62  ;;  %vm892_vm8 = vcmp.eq.f32.partialorder %v1634_v25, %v852_v62  ;;  %vm896_vm6 = vcmp.eq.f32.partialorder %v1657_v63, %v852_v62 }
 0x21a   :  { %v953_v19 = vsel %vm952_vm13, %v906_v34, %v910_v35  ;;  %vm900_vm9 = vcmp.eq.f32.partialorder %v1689_v56, %v852_v62  ;;  %v904_v29 = vsel %vm888_vm7, %v1191_v4, 31  ;;  %v908_v32 = vsel %vm892_vm8, %v1729_v23, 31 }
 0x21b   :  { %vm954_vm11 = vcmp.lt.s32.totalorder %v953_v19, %v914_v50  ;;  %v916_v41 = vsel %vm900_vm9, %v1735_v7, 31  ;;  %v861_v36 = vrot.slane %v860_v6, 1  ;;  %v956_v45 = vsel %vm1894_vm5, %v918_v37, 2147483647 }
 0x21c   :  { %v955_v38 = vsel %vm954_vm11, %v953_v19, %v914_v50  ;;  %vm920_vm1 = vcmp.lt.s32.totalorder %v904_v29, %v908_v32  ;;  %v887_v16 = vmax.f32 %v885_v28, %v886_v52  ;;  %v912_v25 = vsel %vm896_vm6, %v1732_v24, 31 }
 0x21d   :  { %vm957_vm0 = vcmp.lt.s32.totalorder %v955_v38, %v956_v45  ;;  %v921_v40 = vsel %vm920_vm1, %v904_v29, %v908_v32  ;;  %v924_v63 = vsel %vm1895_vm12, %v916_v41, 2147483647  ;;  %v862_v43 = vmax.f32 %v860_v6, %v861_v36 }
 0x21e   :  { %v958_v56 = vsel %vm957_vm0, %v955_v38, %v956_v45  ;;  %vm922_vm4 = vcmp.lt.s32.totalorder %v921_v40, %v912_v25  ;;  %vm891_vm15 = vcmp.eq.f32.partialorder %v1617_v20, %v887_v16  ;;  %vm895_vm3 = vcmp.eq.f32.partialorder %v1636_v27, %v887_v16 }
 0x21f   :  { %v959_v2 = vrot.slane %v958_v56, 4  ;;  %v923_v48 = vsel %vm922_vm4, %v921_v40, %v912_v25  ;;  %vm899_vm13 = vcmp.eq.f32.partialorder %v1661_v11, %v887_v16  ;;  %vm903_vm8 = vcmp.eq.f32.partialorder %v1696_v46, %v887_v16 }
 0x220   :  { %vm925_vm7 = vcmp.lt.s32.totalorder %v923_v48, %v924_v63  ;;  %v907_v51 = vsel %vm891_vm15, %v1191_v4, 31  ;;  %v911_v33 = vsel %vm895_vm3, %v1729_v23, 31  ;;  %v915_v57 = vsel %vm899_vm13, %v1732_v24, 31 }
 0x221   :  { %vm960_vm6 = vcmp.lt.s32.totalorder %v958_v56, %v959_v2  ;;  %v926_v13 = vsel %vm925_vm7, %v923_v48, %v924_v63  ;;  %v968_v20 = vsel %vm873_vm2, %v907_v51, 2147483647  ;;  %v969_v42 = vsel %vm873_vm2, %v911_v33, 2147483647 }
 0x222   :  { %v961_v53 = vsel %vm960_vm6, %v958_v56, %v959_v2  ;;  %v927_v27 = vrot.slane %v926_v13, 4  ;;  %v919_v11 = vsel %vm903_vm8, %v1735_v7, 31  ;;  %vm970_vm9 = vcmp.lt.s32.totalorder %v968_v20, %v969_v42 }
 0x223   :  { %v962_v60 = vrot.slane %v961_v53, 2  ;;  %vm889_vm11 = vcmp.eq.f32.partialorder %v1625_v22, %v862_v43  ;;  %v971_v46 = vsel %vm970_vm9, %v968_v20, %v969_v42  ;;  %v972_v39 = vsel %vm873_vm2, %v915_v57, 2147483647 }
 0x224   :  { %vm928_vm5 = vcmp.lt.s32.totalorder %v926_v13, %v927_v27  ;;  %vm893_vm1 = vcmp.eq.f32.partialorder %v1644_v30, %v862_v43  ;;  %vm973_vm0 = vcmp.lt.s32.totalorder %v971_v46, %v972_v39  ;;  %vm901_vm12 = vcmp.eq.f32.partialorder %v1704_v59, %v862_v43 }
 0x225   :  { %v929_v49 = vsel %vm928_vm5, %v926_v13, %v927_v27  ;;  %v974_v12 = vsel %vm973_vm0, %v971_v46, %v972_v39  ;;  %v975_v10 = vsel %vm879_vm10, %v919_v11, 2147483647  ;;  %vm897_vm4 = vcmp.eq.f32.partialorder %v1669_v8, %v862_v43 }
 0x226   :  { %v905_v54 = vsel %vm889_vm11, %v1191_v4, 31  ;;  %vm963_vm15 = vcmp.lt.s32.totalorder %v961_v53, %v962_v60  ;;  %vm976_vm3 = vcmp.lt.s32.totalorder %v974_v12, %v975_v10  ;;  %v909_v22 = vsel %vm893_vm1, %v1729_v23, 31 }
 0x227   :  { %v930_v61 = vrot.slane %v929_v49, 2  ;;  %v977_v44 = vsel %vm976_vm3, %v974_v12, %v975_v10  ;;  %v917_v1 = vsel %vm901_vm12, %v1735_v7, 31  ;;  %vm936_vm2 = vcmp.lt.s32.totalorder %v905_v54, %v909_v22 }
 0x228   :  { %v978_v30 = vrot.slane %v977_v44, 4  ;;  %v913_v3 = vsel %vm897_vm4, %v1732_v24, 31  ;;  %v937_v59 = vsel %vm936_vm2, %v905_v54, %v909_v22  ;;  %v964_v5 = vsel %vm963_vm15, %v961_v53, %v962_v60 }
 0x229   :  { %vm938_vm13 = vcmp.lt.s32.totalorder %v937_v59, %v913_v3  ;;  %vm1896_vm7 = vcmask 1046528   ;;  %vm931_vm8 = vcmp.lt.s32.totalorder %v929_v49, %v930_v61  ;;  %v965_v15 = vrot.slane %v964_v5, 1 }
 0x22a   :  { %vm979_vm10 = vcmp.lt.s32.totalorder %v977_v44, %v978_v30  ;;  %v939_v47 = vsel %vm938_vm13, %v937_v59, %v913_v3  ;;  %v940_v8 = vsel %vm1896_vm7, %v917_v1, 2147483647  ;;  %v932_v58 = vsel %vm931_vm8, %v929_v49, %v930_v61 }
 0x22b   :  { %v980_v14 = vsel %vm979_vm10, %v977_v44, %v978_v30  ;;  %vm941_vm6 = vcmp.lt.s32.totalorder %v939_v47, %v940_v8  ;;  %vm966_vm5 = vcmp.lt.s32.totalorder %v964_v5, %v965_v15  ;;  %v933_v28 = vrot.slane %v932_v58, 1 }
 0x22c   :  { %v981_v21 = vrot.slane %v980_v14, 2  ;;  %v942_v9 = vsel %vm941_vm6, %v939_v47, %v940_v8  ;;  %v1062_v7 = vunpack.c.0.s8 %v1061_v55  ;;  %v967_v6 = vsel %vm966_vm5, %v964_v5, %v965_v15 }
 0x22d   :  { %v943_v17 = vrot.slane %v942_v9, 4  ;;  %vm934_vm12 = vcmp.lt.s32.totalorder %v932_v58, %v933_v28  ;;  %vm1084_vm15 = vcmp.lt.s32.totalorder %v20_v0, 448  ;;  %vm1032_vm3 = vcmask 261120  }
 0x22e   :  { %vm982_vm9 = vcmp.lt.s32.totalorder %v980_v14, %v981_v21  ;;  %v1065_v50 = vsub.s32 %v1062_v7, %v1191_v4  ;;  %v935_v37 = vsel %vm934_vm12, %v932_v58, %v933_v28  ;;  %vm1897_vm2 = vcmask 785408  }
 0x22f   :  { %v983_v23 = vsel %vm982_vm9, %v980_v14, %v981_v21  ;;  %vm944_vm11 = vcmp.lt.s32.totalorder %v942_v9, %v943_v17  ;;  %vm1898_vm13 = vmmov %vm1897_vm2 }
 0x230   :  { %v984_v24 = vrot.slane %v983_v23, 1  ;;  %v945_v26 = vsel %vm944_vm11, %v942_v9, %v943_v17  ;;  %vm1899_vm10 = vmmov %vm1897_vm2 }
 0x231   :  { %v946_v31 = vrot.slane %v945_v26, 2 }
 0x232   :  { %vm985_vm1 = vcmp.lt.s32.totalorder %v983_v23, %v984_v24 }
 0x233   :  { %v986_v62 = vsel %vm985_vm1, %v983_v23, %v984_v24  ;;  %vm947_vm0 = vcmp.lt.s32.totalorder %v945_v26, %v946_v31 }
 0x234   :  { %v948_v34 = vsel %vm947_vm0, %v945_v26, %v946_v31  ;;  %v1059_v35 = vcombine.low %v967_v6, %v986_v62 }
 0x235   :  { %v949_v52 = vrot.slane %v948_v34, 1 }
 0x236   :  { %v1073_v29 = vrot.slane %v1059_v35, %v1065_v50 }
 0x237   :  { %vm950_vm4 = vcmp.lt.s32.totalorder %v948_v34, %v949_v52 }
 0x238   :  { %v951_v19 = vsel %vm950_vm4, %v948_v34, %v949_v52 }
 0x239   :  { %v1058_v32 = vcombine.low %v935_v37, %v951_v19 }
 0x23b   :  { %v1066_v41 = vrot.slane %v1058_v32, %v1065_v50 }
 0x23d   :  { %v1074_v36 = vcombine.low %v1066_v41, %v1073_v29 }
 0x23f   :  { %v1081_v38 = vrot.slane %v1074_v36, %v1065_v50 }
 0x241   :  { %1086 = vst.msk [vmem:[%s1820_s3] sm:$0xf] %vm1084_vm15, %v1081_v38 }
 0x26e   :  { %v1011_v45 = vpop.permute.xlu1 %1010 }
 0x270   :  { %v1013_v16 = vpop.permute.xlu0 %1012 }
 0x271   :  { %v1034_v4 = vsel %vm1032_vm3, %v1011_v45, %v1013_v16 }
 0x272   :  { %1104 = vst.msk [vmem:[%s1819_s2 + $0x48] sm:$0xff] %vm1897_vm2, %v1034_v4 }
 0x274   :  { %v1019_v25 = vpop.permute.xlu1 %1018  ;;  %v1009_v40 = vpop.permute.xlu0 %1008 }
 0x275   :  { %v1033_v63 = vsel %vm1032_vm3, %v1009_v40, %v1011_v45 }
 0x276   :  { %1103 = vst [vmem:[%s1819_s2 + $0x40] sm:$0xff] %v1033_v63 }
 0x278   :  { %v1017_v0 = vpop.permute.xlu0 %1016  ;;  %v1015_v56 = vpop.permute.xlu1 %1014 }
 0x279   :  { %v1036_v2 = vsel %vm1032_vm3, %v1017_v0, %v1019_v25  ;;  %v1035_v48 = vsel %vm1032_vm3, %v1015_v56, %v1017_v0 }
 0x27a   :  { %1106 = vst.msk [vmem:[%s1819_s2 + $0x58] sm:$0xff] %vm1898_vm13, %v1036_v2  ;;  %1105 = vst [vmem:[%s1819_s2 + $0x50] sm:$0xff] %v1035_v48 }
 0x27c   :  { %v1025_v43 = vpop.permute.xlu0 %1024  ;;  %v1023_v51 = vpop.permute.xlu1 %1022 }
 0x27d   :  { %v1038_v33 = vsel %vm1032_vm3, %v1023_v51, %v1025_v43 }
 0x27e   :  { %1108 = vst.msk [vmem:[%s1819_s2 + $0x68] sm:$0xff] %vm1899_vm10, %v1038_v33 }
 0x280   :  { %v1021_v13 = vpop.permute.xlu0 %1020  ;;  %v1027_v57 = vpop.permute.xlu1 %1026 }
 0x281   :  { %v1037_v20 = vsel %vm1032_vm3, %v1021_v13, %v1023_v51 }
 0x282   :  { %1107 = vst [vmem:[%s1819_s2 + $0x60] sm:$0xff] %v1037_v20 }
 0x284   :  { %v1029_v53 = vpop.permute.xlu0 %1028  ;;  %v1031_v27 = vpop.permute.xlu1 %1030 }
 0x285   :  { %v1039_v42 = vsel %vm1032_vm3, %v1027_v57, %v1029_v53  ;;  %v1040_v60 = vsel %vm1032_vm3, %v1029_v53, %v1031_v27 }
 0x286   :  { %1109 = vst [vmem:[%s1819_s2 + $0x70] sm:$0x7f] %v1039_v42  ;;  %1110 = vst.msk [vmem:[%s1819_s2 + $0x78] sm:$0x7f] %vm994_vm14, %v1040_v60 }

</bundles_post_ra>
